<compile_context>
chip_gen: v7x
topology: tpu7x:2x2x1
jax: 0.10.0
libtpu: 0.0.40
codegen_flags: <defaults>
</compile_context>

<pallas_src>
import jax
import jax.numpy as jnp
from jax.experimental import pallas as pl
from jax.experimental.pallas import tpu as pltpu


def channel_gate_kernel(x_ref, w1t_ref, b1_ref, w2t_ref, b2_ref, o_ref):
    # x_ref block: (TB, C, HW)
    # w1t: (C, Cr), b1: (1, Cr), w2t: (Cr, C), b2: (1, C)
    x = x_ref[...]                                   # (TB, C, HW)
    tb = x.shape[0]
    hw = x.shape[-1]
    inv_hw = 1.0 / hw

    # Global average / max pool over the spatial (lane) axis.
    avg_pool = jnp.sum(x, axis=-1) * inv_hw          # (TB, C)
    max_pool = jnp.max(x, axis=-1)                   # (TB, C)

    # Fused MLP: one pass for both pooling branches.
    pooled = jnp.concatenate([avg_pool, max_pool], axis=0)        # (2*TB, C)
    h = jnp.dot(pooled, w1t_ref[...],
                preferred_element_type=jnp.float32) + b1_ref[...]  # (2*TB, Cr)
    h = jnp.maximum(h, 0.0)                                        # ReLU
    att2 = jnp.dot(h, w2t_ref[...],
                   preferred_element_type=jnp.float32) + b2_ref[...]  # (2*TB, C)

    channel_att_sum = att2[:tb] + att2[tb:]          # (TB, C)  avg-branch + max-branch
    scale = jax.nn.sigmoid(channel_att_sum)          # (TB, C)
    o_ref[...] = (x * scale[:, :, None]).astype(o_ref.dtype)


def _pick_tb(batch, per_image_bytes, target_bytes):
    """Largest divisor TB of batch with TB*per_image_bytes <= target and, when
    batch >= 2, at least 2 grid steps left (so v7x can shard across its 2 TCs)."""
    best = 1
    for tb in range(1, batch + 1):
        if batch % tb != 0:
            continue
        if tb * per_image_bytes > target_bytes:
            continue
        if batch >= 2 and batch // tb < 2:
            continue
        best = tb
    return best


def channel_gate(x, w1, b1, w2, b2, *, target_block_bytes=4 << 20):
    """x: (B, C, H, W). Returns x * sigmoid(mlp(avg_pool) + mlp(max_pool))."""
    B, C, H, W = x.shape
    HW = H * W
    Cr = w1.shape[0]

    x_flat = x.reshape(B, C, HW)
    # Pre-transpose weights once (outside the kernel) so the in-kernel MLP is
    # pooled @ w1t, relu(.) @ w2t with channel staying lane-major; biases as rows.
    w1t = jnp.transpose(w1)          # (C, Cr)
    w2t = jnp.transpose(w2)          # (Cr, C)
    b1r = b1.reshape(1, Cr)
    b2r = b2.reshape(1, C)

    per_image_bytes = C * HW * x.dtype.itemsize
    TB = _pick_tb(B, per_image_bytes, target_block_bytes)
    grid = (B // TB,)

    out = pl.pallas_call(
        channel_gate_kernel,
        out_shape=jax.ShapeDtypeStruct((B, C, HW), x.dtype),
        grid_spec=pltpu.PrefetchScalarGridSpec(
            num_scalar_prefetch=0,
            grid=grid,
            in_specs=[
                pl.BlockSpec((TB, C, HW), lambda b: (b, 0, 0)),
                pl.BlockSpec((C, Cr), lambda b: (0, 0)),
                pl.BlockSpec((1, Cr), lambda b: (0, 0)),
                pl.BlockSpec((Cr, C), lambda b: (0, 0)),
                pl.BlockSpec((1, C), lambda b: (0, 0)),
            ],
            out_specs=pl.BlockSpec((TB, C, HW), lambda b: (b, 0, 0)),
        ),
        compiler_params=pltpu.CompilerParams(
            dimension_semantics=("parallel",)),
    )(x_flat, w1t, b1r, w2t, b2r)

    return out.reshape(B, C, H, W)


def channel_gate_ref(x, w1, b1, w2, b2):
    """Pure-JAX reference matching the PyTorch forward (dims=2, ['avg','max'])."""
    avg = jnp.mean(x, axis=(2, 3))                       # (B, C)
    mx = jnp.max(x, axis=(2, 3))                         # (B, C)

    def mlp(p):  # p: (B, C); PyTorch Linear: y = p @ W.T + b
        h = jnp.maximum(p @ w1.T + b1, 0.0)
        return h @ w2.T + b2

    att = mlp(avg) + mlp(mx)                             # (B, C)
    scale = jax.nn.sigmoid(att)[:, :, None, None]
    return x * scale


if __name__ == "__main__":
    # Small shapes consistent with the module:
    # gate_channels=32, reduction_ratio=16 -> hidden=2 ; batch=2, spatial=16x16.
    B, C, H, W = 2, 32, 16, 16
    reduction_ratio = 16
    Cr = C // reduction_ratio

    key = jax.random.PRNGKey(0)
    kx, kw1, kb1, kw2, kb2 = jax.random.split(key, 5)

    x = jax.random.normal(kx, (B, C, H, W), dtype=jnp.float32)
    # PyTorch Linear weight layout: (out_features, in_features)
    w1 = jax.random.normal(kw1, (Cr, C), dtype=jnp.float32) * 0.1
    b1 = jax.random.normal(kb1, (Cr,), dtype=jnp.float32) * 0.1
    w2 = jax.random.normal(kw2, (C, Cr), dtype=jnp.float32) * 0.1
    b2 = jax.random.normal(kb2, (C,), dtype=jnp.float32) * 0.1

    out = channel_gate(x, w1, b1, w2, b2)
    out = jax.block_until_ready(out)

    ref = channel_gate_ref(x, w1, b1, w2, b2)
    assert out.shape == x.shape
    assert jnp.allclose(out, ref, atol=1e-5, rtol=1e-5), "mismatch vs reference"

    print("KERNEL_OK")
</pallas_src>

<mosaic_0001>
module attributes {stable_mosaic.version = 11 : i64} {
  func.func @channel_gate_kernel(%arg0: i32, %arg1: memref<1x32x256xf32, #tpu.memory_space<vmem>>, %arg2: memref<32x2xf32, #tpu.memory_space<vmem>>, %arg3: memref<1x2xf32, #tpu.memory_space<vmem>>, %arg4: memref<2x32xf32, #tpu.memory_space<vmem>>, %arg5: memref<1x32xf32, #tpu.memory_space<vmem>>, %arg6: memref<1x32x256xf32, #tpu.memory_space<vmem>>) attributes {dimension_semantics = [#tpu.dimension_semantics<parallel>], iteration_bounds = array<i64: 2>, scalar_prefetch = 0 : i64, scratch_operands = 0 : i64, tpu.core_type = #tpu.core_type<tc>, window_params = [{transform_indices = @transform_0, window_bounds = array<i64: 1, 32, 256>}, {pipeline_mode = #tpu.pipeline_mode<synchronous>, transform_indices = @transform_1, window_bounds = array<i64: 32, 2>}, {pipeline_mode = #tpu.pipeline_mode<synchronous>, transform_indices = @transform_2, window_bounds = array<i64: 1, 2>}, {pipeline_mode = #tpu.pipeline_mode<synchronous>, transform_indices = @transform_3, window_bounds = array<i64: 2, 32>}, {pipeline_mode = #tpu.pipeline_mode<synchronous>, transform_indices = @transform_4, window_bounds = array<i64: 1, 32>}, {transform_indices = @transform_5, window_bounds = array<i64: 1, 32, 256>}]} {
    %c0 = arith.constant 0 : index
    %c0_0 = arith.constant 0 : index
    %c0_1 = arith.constant 0 : index
    %0 = vector.load %arg1[%c0, %c0_0, %c0_1] : memref<1x32x256xf32, #tpu.memory_space<vmem>>, vector<1x32x256xf32>
    %cst = arith.constant dense<0.000000e+00> : vector<1x32xf32>
    %1 = vector.multi_reduction <add>, %0, %cst [2] : vector<1x32x256xf32> to vector<1x32xf32>
    %cst_2 = arith.constant 3.906250e-03 : f32
    %2 = vector.broadcast %cst_2 : f32 to vector<1x32xf32>
    %3 = arith.mulf %1, %2 : vector<1x32xf32>
    %cst_3 = arith.constant dense<0xFF800000> : vector<1x32xf32>
    %4 = vector.multi_reduction <maximumf>, %0, %cst_3 [2] : vector<1x32x256xf32> to vector<1x32xf32>
    %5 = tpu.concatenate %3, %4 in 0 : vector<1x32xf32>, vector<1x32xf32> -> vector<2x32xf32>
    %c0_4 = arith.constant 0 : index
    %c0_5 = arith.constant 0 : index
    %6 = vector.load %arg2[%c0_4, %c0_5] : memref<32x2xf32, #tpu.memory_space<vmem>>, vector<32x2xf32>
    %cst_6 = arith.constant dense<0.000000e+00> : vector<2x2xf32>
    %7 = tpu.matmul %5, %6, %cst_6 {dimension_numbers = #tpu.dot_dimension_numbers<[1], [0], [0], [1], [0, 0, 1, 1], [], []>} : vector<2x32xf32>, vector<32x2xf32>, vector<2x2xf32> -> vector<2x2xf32>
    %c0_7 = arith.constant 0 : index
    %c0_8 = arith.constant 0 : index
    %8 = vector.load %arg3[%c0_7, %c0_8] : memref<1x2xf32, #tpu.memory_space<vmem>>, vector<1x2xf32>
    %9 = vector.broadcast %8 : vector<1x2xf32> to vector<2x2xf32>
    %10 = arith.addf %7, %9 : vector<2x2xf32>
    %cst_9 = arith.constant 0.000000e+00 : f32
    %11 = vector.broadcast %cst_9 : f32 to vector<2x2xf32>
    %12 = arith.maximumf %10, %11 : vector<2x2xf32>
    %c0_10 = arith.constant 0 : index
    %c0_11 = arith.constant 0 : index
    %13 = vector.load %arg4[%c0_10, %c0_11] : memref<2x32xf32, #tpu.memory_space<vmem>>, vector<2x32xf32>
    %cst_12 = arith.constant dense<0.000000e+00> : vector<2x32xf32>
    %14 = tpu.matmul %12, %13, %cst_12 {dimension_numbers = #tpu.dot_dimension_numbers<[1], [0], [0], [1], [0, 0, 1, 1], [], []>} : vector<2x2xf32>, vector<2x32xf32>, vector<2x32xf32> -> vector<2x32xf32>
    %c0_13 = arith.constant 0 : index
    %c0_14 = arith.constant 0 : index
    %15 = vector.load %arg5[%c0_13, %c0_14] : memref<1x32xf32, #tpu.memory_space<vmem>>, vector<1x32xf32>
    %16 = vector.broadcast %15 : vector<1x32xf32> to vector<2x32xf32>
    %17 = arith.addf %14, %16 : vector<2x32xf32>
    %18 = vector.extract_strided_slice %17 {offsets = [0, 0], sizes = [1, 32], strides = [1, 1]} : vector<2x32xf32> to vector<1x32xf32>
    %19 = vector.extract_strided_slice %17 {offsets = [1, 0], sizes = [1, 32], strides = [1, 1]} : vector<2x32xf32> to vector<1x32xf32>
    %20 = arith.addf %18, %19 : vector<1x32xf32>
    %21 = arith.negf %20 : vector<1x32xf32>
    %22 = math.exp %21 : vector<1x32xf32>
    %cst_15 = arith.constant 1.000000e+00 : f32
    %23 = vector.broadcast %cst_15 : f32 to vector<1x32xf32>
    %24 = arith.addf %23, %22 : vector<1x32xf32>
    %25 = arith.divf %23, %24 : vector<1x32xf32>
    %26 = vector.shape_cast %25 : vector<1x32xf32> to vector<1x32x1xf32>
    %27 = vector.broadcast %26 : vector<1x32x1xf32> to vector<1x32x256xf32>
    %28 = arith.mulf %0, %27 : vector<1x32x256xf32>
    %c0_16 = arith.constant 0 : index
    %c0_17 = arith.constant 0 : index
    %c0_18 = arith.constant 0 : index
    %29 = vector.load %arg6[%c0_16, %c0_17, %c0_18] : memref<1x32x256xf32, #tpu.memory_space<vmem>>, vector<1x32x256xf32>
    tpu.vector_store %arg6[%c0_16, %c0_17, %c0_18], %28 {strides = array<i32>} : memref<1x32x256xf32, #tpu.memory_space<vmem>>, vector<1x32x256xf32>,
    return
  }
  func.func @transform_0(%arg0: i32) -> (i32, i32, i32) {
    %c0_i32 = arith.constant 0 : i32
    %c0_i32_0 = arith.constant 0 : i32
    %c0_i32_1 = arith.constant 0 : i32
    return %arg0, %c0_i32, %c0_i32_0 : i32, i32, i32
  }
  func.func @transform_1(%arg0: i32) -> (i32, i32) {
    %c0_i32 = arith.constant 0 : i32
    %c0_i32_0 = arith.constant 0 : i32
    %c0_i32_1 = arith.constant 0 : i32
    return %c0_i32, %c0_i32_0 : i32, i32
  }
  func.func @transform_2(%arg0: i32) -> (i32, i32) {
    %c0_i32 = arith.constant 0 : i32
    %c0_i32_0 = arith.constant 0 : i32
    %c0_i32_1 = arith.constant 0 : i32
    return %c0_i32, %c0_i32_0 : i32, i32
  }
  func.func @transform_3(%arg0: i32) -> (i32, i32) {
    %c0_i32 = arith.constant 0 : i32
    %c0_i32_0 = arith.constant 0 : i32
    %c0_i32_1 = arith.constant 0 : i32
    return %c0_i32, %c0_i32_0 : i32, i32
  }
  func.func @transform_4(%arg0: i32) -> (i32, i32) {
    %c0_i32 = arith.constant 0 : i32
    %c0_i32_0 = arith.constant 0 : i32
    %c0_i32_1 = arith.constant 0 : i32
    return %c0_i32, %c0_i32_0 : i32, i32
  }
  func.func @transform_5(%arg0: i32) -> (i32, i32, i32) {
    %c0_i32 = arith.constant 0 : i32
    %c0_i32_0 = arith.constant 0 : i32
    %c0_i32_1 = arith.constant 0 : i32
    return %arg0, %c0_i32, %c0_i32_0 : i32, i32, i32
  }
}

</mosaic_0001>

<bundles_post_ra>
// kernel: tpu_custom_call.1
= control target key start
LH: loop header
LB: loop body
LE: loop exit
PB: predicated region body
PF: predicated region fallthrough
CT: control target
= control target key end

     0   :  { %10 = vsyncpa [#allocation3], 0  ;;  %s1122_s0 = inlined_call_operand.hbm [shape: f32[2,32,256], index: 0, kind: input, shape index: {}]   ;;  %s1123_s1 = inlined_call_operand.vmem [shape: f32[32,2], index: 1, kind: input, shape index: {}]   ;;  %s1124_s2 = inlined_call_operand.vmem [shape: f32[1,2], index: 2, kind: input, shape index: {}]   ;;  %s1125_s3 = inlined_call_operand.vmem [shape: f32[2,32], index: 3, kind: input, shape index: {}]   ;;  %s1126_s4 = inlined_call_operand.vmem [shape: f32[1,32], index: 4, kind: input, shape index: {}]   ;;  %s1127_s5 = inlined_call_operand.hbm [shape: f32[2,32,256], index: 5, kind: output, shape index: {}]  }
   0x1   :  { %12 = vsyncpa [#allocation3 + $0x1], 0 }
   0x2   :  { %13 = vsyncpa [#allocation4], 0 }
   0x3   :  { %15 = vsyncpa [#allocation4 + $0x1], 0  ;;  %s886_s18 = smov 0   ;;  %s888_s19 = smov 0  }
   0x4   :  { %s890_s20 = smov 0   ;;  %s892_s21 = smov 0  }
   0x5 LB: > { %s907_s22 = sadd.s32 4294967295, %s845_s21   ;;  %s641_s23 = sadd.s32 4294967294, %s845_s21   ;;  %s845_s21 = sphi %s892_s21, %s1140_s21   ;;  %s841_s20 = sphi %s890_s20, %s1139_s20   ;;  %s837_s19 = sphi %s888_s19, %s1138_s19   ;;  %s833_s18 = sphi %s886_s18, %s1137_s18  }
   0x6   : > { %s911_s24 = sadd.s32 1, %s845_s21   ;;  %s28_s25 = sadd.s32 1, %s841_s20 }
   0x7   : > { %s25_s26 = ssub.s32 %s845_s21, %s911_s24  ;;  %p35_p0 = scmp.ne.s32.totalorder %s841_s20, %s837_s19 }
   0x8   : > { %p26_p1 = scmp.eq.s32.totalorder %s25_s26, 0  ;;  %p36_p2 = scmp.eq.s32.totalorder %s845_s21, 0 }
   0x9   : > { %p41_p3 = scmp.ne.s32.totalorder %s837_s19, %s833_s18  ;;  %p42_p4 = scmp.eq.s32.totalorder %s907_s22, 0 }
   0xa   : > { %s923_s27 = scalar_select %p26_p1, %s841_s20, %s28_s25  }
   0xb   : > { %p925_p5 = por %p36_p2, %p35_p0  ;;  %p929_p6 = por %p42_p4, %p41_p3 }
   0xc   : > { %p149_p7 = scmp.eq.s32.totalorder %s907_s22, 1  ;;  %p155_p8 = scmp.eq.s32.totalorder %s641_s23, 1 }
   0xd   : > { %p704_p10 = scmp.lt.s32.totalorder %s845_s21, 2  ;;  %s187_s7 = sand.u32 1, %s841_s20  }
   0xe   : > { %p936_p11 = por %p149_p7, %p35_p0  ;;  %p940_p12 = por %p155_p8, %p41_p3 }
   0xf   : > { %s661_s8 = sshll.u32 %s845_s21, 10  ;;  %s644_s9 = sshll.u32 %s187_s7, 6 }
  0x10   : > { %s1131_s30 = scalar_select %p936_p11, 1, 0 }
  0x11   : > { %s1132_s6 = scalar_select %p940_p12, 1, 0 }
  0x12   : > { %s949_s12 = scalar_lea.hbm %s1122_s0, %s661_s8  ;;  %s191_s13 = scalar_lea.vmem [#allocation2], %s644_s9 }
  0x13   : > { %s198_s14 = sshll.u32 %s191_s13, 4  ;;  %p953_p13 = pnand %p704_p10, %p925_p5  ;;  %s957_s14 = int_to_ptr.vmem [resolvable:$true] %s198_s14 }
  0x14   : > { %s959_s16 = scalar_lea.sflag [#allocation3], %s187_s7  ;;  %s749_s17 = scalar_lea.hbm %s949_s12, 1024 }
  0x15   : > { %p750_p0 = scmp.ne.s32.totalorder %s949_s12, %s749_s17  ;;  %p751_p1 = pneg %p953_p13 }
  0x16   : > { %s754_s26 = scalar_lea.hbm %s1122_s0, 2048  ;;  %p755_p4 = scmp.lt.u32.totalorder %s949_s12, %s1122_s0 }
  0x17   : > { %p752_p2 = pnand %p751_p1, %p750_p0  ;;  %p756_p5 = scmp.lt.u32.totalorder %s754_s26, %s749_s17 }
  0x18   : > { %p758_p8 = scmp.lt.u32.totalorder %s749_s17, %s949_s12 }
  0x19   : > { %p753_p3 = pneg %p752_p2  ;;  %p757_p7 = por %p756_p5, %p755_p4 }
  0x1b   : > { %p759_p10 = por %p758_p8, %p757_p7 }
  0x1d   : > { %p760_p9 = pnand %p759_p10, %p753_p3 }
  0x1f   : > { %763 = shalt.err (!%p760_p9)
}
  0x20   : > { %s764_s7 = scalar_lea.vmem %s957_s14, 1024  ;;  %s847_s9 = smov [#allocation2]  }
  0x21   : > { %p765_p0 = scmp.ne.s32.totalorder %s957_s14, %s764_s7  ;;  %s769_s10 = sshll.u32 %s847_s9, 4  ;;  %s770_s10 = int_to_ptr.vmem [resolvable:$false] %s769_s10 }
  0x22   : > { %s771_s11 = scalar_lea.vmem %s770_s10, 2048  ;;  %p772_p11 = scmp.lt.s32.totalorder %s957_s14, %s770_s10 }
  0x23   : > { %p767_p2 = pnand %p765_p0, %p751_p1  ;;  %p773_p4 = scmp.lt.s32.totalorder %s771_s11, %s764_s7 }
  0x25   : > { %p768_p12 = pneg %p767_p2  ;;  %p774_p5 = por %p773_p4, %p772_p11 }
  0x27   : > { %p775_p7 = pnand %p774_p5, %p768_p12 }
  0x29   : > { %778 = shalt.err (!%p775_p7)
}
  0x2a   : > { %s848_s13 = smov 256   ;;  %s849_s17 = smov 16  }
  0x2b   : > { %699 = dma.hbm_to_vmem [thread:$0]  (!%p953_p13), %s949_s12, 1024, %s957_s14, %s959_s16, %s848_s13, %s848_s13, %s849_s17  }
  0x2c   : > { %p647_p9 = scmp.ge.s32.totalorder %s845_s21, 1  ;;  %p206_p1 = scmp.lt.s32.totalorder %s845_s21, 3 }
  0x2e   : > { %p207_p3 = pnand %p647_p9, %p206_p1 }
  0x2f   : > { %s990_s23 = sand.u32 (!%p207_p3), 1, %s837_s19  }
  0x30   : > { %210 = sbr.rel (%p207_p3) target bundleno = 821 (0x335), region = 40  ;;  %s648_s25 = sshll.u32 (!%p207_p3), %s990_s23, 6 }
  0x31   : > { %s213_s26 = scalar_lea.sflag (!%p207_p3), [#allocation3], %s990_s23  ;;  %s216_s28 = scalar_lea.vmem (!%p207_p3), [#allocation2], %s648_s25 }
  0x37   : > { %824 = dma.done.wait (%p929_p6), %s213_s26, 1024  }
  0x38   : > { %826 = vsyncadd (%p929_p6), %s213_s26, 4294966272  ;;  %v1000_v0 = vld [vmem:[%s216_s28 + $0x20] sm:$0xff]  ;;  %v1002_v1 = vld [vmem:[%s216_s28 + $0x28] sm:$0xff]  ;;  %v850_v19 = vmov 0.0|0.0   ;;  %vm851_vm0 = vmmov 0   ;;  %v852_v23 = vmov 0.0   ;;  %v283_v24 = vlaneseq }
  0x39   : > { %v1004_v2 = vld [vmem:[%s216_s28] sm:$0xff]  ;;  %v257_v3 = vadd.f32 %v1002_v1, %v1000_v0  ;;  %v1008_v4 = vld [vmem:[%s216_s28 + $0x8] sm:$0xff]  ;;  %v1010_v5 = vld [vmem:[%s216_s28 + $0x30] sm:$0xff]  ;;  %v273_v15 = vmax.f32 %v1000_v0, %v1002_v1  ;;  %686 = vmatprep.subr.bf16.mxu0 %v850_v19  ;;  %678 = vmatprep.mubr.msk.f32.mxu0 %vm851_vm0, %v852_v23  ;;  %vm294_vm1 = vcmask 130112   ;;  %vm301_vm2 = vcmask 195712   ;;  %s242_s29 = scalar_lea.vmem [#allocation5], %s648_s25 }
  0x3a   : > { %v1012_v6 = vld [vmem:[%s216_s28 + $0x38] sm:$0xff]  ;;  %v251_v7 = vadd.f32 %v1008_v4, %v1004_v2  ;;  %v1016_v8 = vld [vmem:[%s216_s28 + $0x10] sm:$0xff]  ;;  %v267_v13 = vmax.f32 %v1004_v2, %v1008_v4  ;;  %v337_v16 = vld [vmem:[%s1123_s1] sm:$0xff]  ;;  %681 = vmatprep.subr.mxu1 %v852_v23  ;;  %683 = vmatprep.mubr.msk.f32.mxu1 %vm851_vm0, %v852_v23  ;;  %v284_v25 = vand.u32 127, %v283_v24  ;;  %v1044_v28 = vshrl.u32 %v283_v24, 7  ;;  %s568_s12 = sshll.u32 %s242_s29, 4  ;;  %s1071_s12 = int_to_ptr.vmem [resolvable:$true] %s568_s12 }
  0x3b   : > { %v1018_v9 = vld [vmem:[%s216_s28 + $0x18] sm:$0xff]  ;;  %258 = vadd.xlane.f32.xlu1 %v257_v3  ;;  %v260_v10 = vadd.f32 %v1012_v6, %v1010_v5  ;;  %v276_v14 = vmax.f32 %v1010_v5, %v1012_v6  ;;  %v338_v17 = vld [vmem:[%s1123_s1 + $0x8] sm:$0xff]  ;;  %v339_v20 = vld [vmem:[%s1123_s1 + $0x10] sm:$0xff]  ;;  %vm308_vm3 = vcmask 261312   ;;  %vm335_vm4 = vcmask 1040384   ;;  %s662_s14 = sshll.u32 %s907_s22, 10 }
  0x3c   : > { %252 = vadd.xlane.f32.xlu0 %v251_v7  ;;  %v254_v11 = vadd.f32 %v1018_v9, %v1016_v8  ;;  %v270_v12 = vmax.f32 %v1016_v8, %v1018_v9  ;;  %v687_v18 = vpack.c.bf16 %v338_v17, %v337_v16  ;;  %v340_v21 = vld [vmem:[%s1123_s1 + $0x18] sm:$0xff]  ;;  %v289_v27 = vadd.s32 4294967288, %v284_v25  ;;  %v423_v61 = vld [vmem:[%s1125_s3] sm:$0x3]  ;;  %s1076_s16 = scalar_lea.hbm %s1127_s5, %s662_s14  ;;  %s555_s22 = scalar_lea.sflag [#allocation4], %s990_s23 }
  0x3d   : > { %v690_v22 = vpack.c.bf16 %v340_v21, %v339_v20  ;;  %v296_v30 = vadd.s32 4294967280, %v284_v25  ;;  %v287_v33 = vsub.s32 %v284_v25, %v1044_v28  ;;  %v303_v35 = vadd.s32 4294967272, %v284_v25  ;;  %v650_v62 = vld [vmem:[%s1124_s2] ss:$0 sm:$0xff]  ;;  %s779_s8 = scalar_lea.vmem %s1071_s12, 1024  ;;  %p1134_p11 = scmp.ne.s32.totalorder %s1131_s30, 0 }
  0x3e   : > { %688 = vmatpush3.bf16.msra.mxu0 %v687_v18  ;;  %v292_v32 = vsub.s32 %v289_v27, %v1044_v28  ;;  %vm348_vm5 = vcmask 261120   ;;  %vm435_vm6 = vcmask 1041408   ;;  %vm431_vm7 = vcmask 15360   ;;  %p780_p6 = scmp.ne.s32.totalorder %s1071_s12, %s779_s8  ;;  %s853_s7 = smov [#allocation5]  }
  0x3f   : > { %261 = vadd.xlane.f32.xlu1 %v260_v10  ;;  %689 = vmatprep.subr.bf16.mxu0 %v850_v19  ;;  %v299_v38 = vsub.s32 %v296_v30, %v1044_v28  ;;  %v306_v43 = vsub.s32 %v303_v35, %v1044_v28  ;;  %v521_v20 = vsub.s32 0, %v1044_v28  ;;  %s783_s9 = sshll.u32 %s853_s7, 4  ;;  %s784_s9 = int_to_ptr.vmem [resolvable:$false] %s783_s9 }
  0x40   : > { %255 = vadd.xlane.f32.xlu0 %v254_v11  ;;  %682 = vmatpush3.msk.msra.mxu1 %vm435_vm6, %v423_v61  ;;  %v652_v11 = vld [vmem:[%s1126_s4] ss:$0 sm:$0xff]  ;;  %p781_p12 = pnand %p780_p6, %p1134_p11  ;;  %s785_s10 = scalar_lea.vmem %s784_s9, 2048 }
  0x41   : > { %p786_p8 = scmp.lt.s32.totalorder %s1071_s12, %s784_s9  ;;  %p787_p10 = scmp.lt.s32.totalorder %s785_s10, %s779_s8 }
  0x42   : > { %691 = vmatpush3.bf16.msra.mxu0 %v690_v22  ;;  %p782_p13 = pneg %p781_p12 }
  0x43   : > { %271 = vmax.xlane.f32.xlu1 %v270_v12  ;;  %p788_p0 = por %p787_p10, %p786_p8 }
  0x44   : > { %268 = vmax.xlane.f32.xlu0 %v267_v13 }
  0x45   : > { %p789_p2 = pnand %p788_p0, %p782_p13 }
  0x47   : > { %277 = vmax.xlane.f32.xlu1 %v276_v14 }
  0x48   : > { %274 = vmax.xlane.f32.xlu0 %v273_v15 }
  0xc8   : > { %v259_v26 = vpop.xlane.xlu1 %258 }
  0xc9   : > { %v253_v29 = vpop.xlane.xlu0 %252  ;;  %v265_v39 = vmul.f32 0.00390625, %v259_v26 }
  0xca   : > { %v263_v34 = vmul.f32 0.00390625, %v253_v29 }
  0xcb   : > { %v300_v49 = vrot.slane %v265_v39, %v299_v38 }
  0xcc   : > { %v262_v31 = vpop.xlane.xlu1 %261  ;;  %v288_v42 = vrot.slane %v263_v34, %v287_v33 }
  0xcd   : > { %v256_v36 = vpop.xlane.xlu0 %255  ;;  %v266_v44 = vmul.f32 0.00390625, %v262_v31 }
  0xce   : > { %v264_v37 = vmul.f32 0.00390625, %v256_v36 }
  0xcf   : > { %v307_v51 = vrot.slane %v266_v44, %v306_v43 }
  0xd0   : > { %v293_v40 = vrot.slane %v264_v37, %v292_v32  ;;  %v272_v41 = vpop.xlane.xlu1 %271 }
  0xd1   : > { %v269_v45 = vpop.xlane.xlu0 %268  ;;  %v322_v47 = vrot.slane %v272_v41, %v292_v32 }
  0xd2   : > { %v295_v46 = vsel %vm294_vm1, %v293_v40, %v288_v42  ;;  %v318_v48 = vrot.slane %v269_v45, %v287_v33 }
  0xd3   : > { %v302_v55 = vsel %vm301_vm2, %v300_v49, %v295_v46 }
  0xd4   : > { %v278_v50 = vpop.xlane.xlu1 %277  ;;  %v323_v56 = vsel %vm294_vm1, %v322_v47, %v318_v48  ;;  %v309_v59 = vsel %vm308_vm3, %v307_v51, %v302_v55 }
  0xd5   : > { %v275_v52 = vpop.xlane.xlu0 %274  ;;  %v332_v53 = vrot.slane %v278_v50, %v306_v43 }
  0xd6   : > { %v327_v54 = vrot.slane %v275_v52, %v299_v38 }
  0xd8   : > { %v328_v57 = vsel %vm301_vm2, %v327_v54, %v323_v56 }
  0xd9   : > { %v333_v58 = vsel %vm308_vm3, %v332_v53, %v328_v57 }
  0xda   : > { %v336_v60 = vsel %vm335_vm4, %v309_v59, %v333_v58 }
  0xdb   : > { %679 = vmatmul.mubr.msk.f32.vlgmr.msra.gmra.mrb[0].mxu0 %vm348_vm5, %v336_v60 }
 0x1ae   : > { %v418_v63 = vpop.f32.mrb[0].mxu0 }
 0x1af   : > { %v419_v3 = vadd.f32 %v650_v62, %v418_v63  ;;  %v680_v7 = vpop.f32.mrb[1].mxu0 }
 0x1b1   : > { %v422_v10 = vmax.f32 %v419_v3, 0.0 }
 0x1b3   : > { %684 = vmatmul.mubr.msk.f32.vlgmr.msra.gmra.mrb[0].mxu1 %vm431_vm7, %v422_v10 }
 0x286   : > { %v505_v12 = vpop.f32.mrb[0].mxu1 }
 0x287   : > { %v506_v13 = vadd.f32 %v652_v11, %v505_v12  ;;  %v685_v14 = vpop.f32.mrb[1].mxu1 }
 0x289   : > { %v510_v15 = vrot.slane %v506_v13, 1 }
 0x28b   : > { %v512_v16 = vadd.f32 %v510_v15, %v506_v13 }
 0x28d   : > { %v655_v17 = vmul.f32 -1.442695, %v512_v16 }
 0x28f   : > { %745 = vpow2.f32 %v655_v17 }
 0x299   : > { %v746_v18 = vpop.eup %745 }
 0x29a   : > { %v516_v19 = vadd.f32 1.0, %v746_v18 }
 0x29c   : > { %747 = vrcp.f32 %v516_v19 }
 0x2a6   : > { %v748_v21 = vpop.eup %747 }
 0x2a7   : > { %v522_v22 = vrot.slane %v748_v21, %v521_v20 }
 0x2a9   : > { %528 = vbcast.lane.b32.xlu1 %v522_v22, 264  ;;  %524 = vbcast.lane.b32.xlu0 %v522_v22, 256 }
 0x2ad   : > { %532 = vbcast.lane.b32.xlu1 %v522_v22, 272 }
 0x2b1   : > { %536 = vbcast.lane.b32.xlu1 %v522_v22, 280 }
 0x31b   : > { %v529_v23 = vpop.permute.xlu1 %528  ;;  %v525_v24 = vpop.permute.xlu0 %524 }
 0x31c   : > { %v540_v25 = vmul.f32 %v529_v23, %v1016_v8  ;;  %v541_v26 = vmul.f32 %v529_v23, %v1018_v9  ;;  %v538_v27 = vmul.f32 %v525_v24, %v1004_v2  ;;  %v539_v29 = vmul.f32 %v525_v24, %v1008_v4 }
 0x31e   : > { %548 = vst [vmem:[%s242_s29 + $0x10] sm:$0xff] %v540_v25  ;;  %549 = vst [vmem:[%s242_s29 + $0x18] sm:$0xff] %v541_v26 }
 0x31f   : > { %546 = vst [vmem:[%s242_s29] sm:$0xff] %v538_v27  ;;  %547 = vst [vmem:[%s242_s29 + $0x8] sm:$0xff] %v539_v29  ;;  %v533_v28 = vpop.permute.xlu1 %532 }
 0x320   : > { %v542_v30 = vmul.f32 %v533_v28, %v1000_v0  ;;  %v543_v8 = vmul.f32 %v533_v28, %v1002_v1 }
 0x322   : > { %550 = vst [vmem:[%s242_s29 + $0x20] sm:$0xff] %v542_v30  ;;  %551 = vst [vmem:[%s242_s29 + $0x28] sm:$0xff] %v543_v8 }
 0x323   : > { %v537_v2 = vpop.permute.xlu1 %536 }
 0x324   : > { %v544_v4 = vmul.f32 %v537_v2, %v1010_v5  ;;  %v545_v0 = vmul.f32 %v537_v2, %v1012_v6 }
 0x326   : > { %552 = vst [vmem:[%s242_s29 + $0x30] sm:$0xff] %v544_v4  ;;  %553 = vst [vmem:[%s242_s29 + $0x38] sm:$0xff] %v545_v0 }
 0x327   : > { %792 = shalt.err (!%p789_p2)
}
 0x328   : > { %s793_s11 = scalar_lea.hbm %s1076_s16, 1024  ;;  %s797_s26 = scalar_lea.hbm %s1127_s5, 2048 }
 0x329   : > { %p794_p4 = scmp.ne.s32.totalorder %s1076_s16, %s793_s11  ;;  %p798_p9 = scmp.lt.u32.totalorder %s1076_s16, %s1127_s5 }
 0x32a   : > { %p799_p1 = scmp.lt.u32.totalorder %s797_s26, %s793_s11  ;;  %p801_p6 = scmp.lt.u32.totalorder %s793_s11, %s1076_s16 }
 0x32b   : > { %p795_p5 = pnand %p794_p4, %p1134_p11 }
 0x32c   : > { %p800_p3 = por %p799_p1, %p798_p9 }
 0x32d   : > { %p796_p7 = pneg %p795_p5 }
 0x32e   : > { %p802_p12 = por %p801_p6, %p800_p3 }
 0x330   : > { %p803_p13 = pnand %p802_p12, %p796_p7 }
 0x332   : > { %806 = shalt.err (!%p803_p13)
}
 0x333   : > { %s854_s14 = smov 256   ;;  %s855_s25 = smov 16  }
 0x334   : > { %694 = dma.vmem_to_hbm [thread:$0]  (%p1134_p11), %s1071_s12, 1024, %s1076_s16, %s555_s22, %s854_s14, %s854_s14, %s855_s25  }
 0x335 PF: > { %s583_s15 = sand.u32 1, %s833_s18   ;;  %p1135_p8 = scmp.ne.s32.totalorder %s1132_s6, 0 }
 0x336   : > { %p1136_p10 = scmp.ge.s32.totalorder %s845_s21, 2  ;;  %s584_s8 = scalar_lea.sflag [#allocation4], %s583_s15 }
 0x338   : > { %p701_p0 = pnand %p1136_p10, %p1135_p8 }
 0x33a   : > { %828 = dma.done.wait (!%p701_p0), %s584_s8, 1024  }
 0x33b   : > { %830 = vsyncadd (!%p701_p0), %s584_s8, 4294966272  ;;  %p18_p2 = scmp.ge.s32.totalorder %s911_s24, 4   ;;  %s1137_s18 = smov %s837_s19 }
 0x33c   : > { %s1138_s19 = smov %s841_s20  ;;  %s1139_s20 = smov %s923_s27 }
 0x33d   : > { %s1140_s21 = smov %s911_s24  ;;  %20 = sbr.rel (!%p18_p2) target bundleno = 5 (0x5), region = 85 }
 0x344   :  { %589 = vsyncpa [#allocation3], 1 }
 0x345   :  { %591 = vsyncpa [#allocation3 + $0x1], 1 }
 0x346   :  { %592 = vsyncpa [#allocation4], 1 }
 0x347   :  { %594 = vsyncpa [#allocation4 + $0x1], 1 }

</bundles_post_ra>
